<compile_context>
chip_gen: v5e
topology: v5e:2x2
jax: 0.10.0
libtpu: 0.0.40
codegen_flags: <defaults>
</compile_context>

<pallas_src>
import functools

import jax
import jax.numpy as jnp
from jax import lax
from jax.experimental import pallas as pl
from jax.experimental.pallas import tpu as pltpu


_NSEM = 16  # max in-flight row DMAs per grid step (round-robin semaphores)


def _pick_s_tile(s_pad: int, d: int) -> int:
    """Pick a row-tile size: multiple of 8, divides s_pad, <= ~2 MiB of f32."""
    budget_rows = max(8, (2 * 1024 * 1024) // max(1, d * 4))
    t = min(s_pad, 512, budget_rows)
    t -= t % 8
    t = max(t, 8)
    while s_pad % t:
        t -= 8
    return t


def _gather_rows_kernel(pos_ref, w_hbm, out_ref, sems, *, s_tile: int):
    """DMA row gather for one (batch, row-tile) grid step.

    pos_ref : (B, S_pad) int32 in SMEM (scalar prefetch) -- absolute table rows.
    w_hbm   : (V, D) embedding table, left in HBM (memory_space=pl.ANY).
    out_ref : (s_tile, D) VMEM output block (pipelined back to HBM by Pallas).
    sems    : (_NSEM,) DMA semaphores, round-robin over in-flight copies.
    """
    b = pl.program_id(0)
    st = pl.program_id(1)
    base = st * s_tile
    k = min(_NSEM, s_tile)

    def _start(r, slot):
        row = pos_ref[b, base + r]          # scalar read from SMEM
        pltpu.make_async_copy(
            w_hbm.at[pl.ds(row, 1), :],     # (1, D) table row in HBM
            out_ref.at[pl.ds(r, 1), :],     # (1, D) slot in the output block
            sems.at[slot],
        ).start()

    def _wait(r, slot):
        # Wait descriptor only needs the right shape / byte count.
        pltpu.make_async_copy(
            w_hbm.at[pl.ds(0, 1), :],
            out_ref.at[pl.ds(r, 1), :],
            sems.at[slot],
        ).wait()

    def body(r, carry):
        # Retire the copy issued k iterations ago (it used the same sem slot),
        # keeping at most k row DMAs in flight.
        @pl.when(r >= k)
        def _():
            _wait(r - k, r % k)
        _start(r, r % k)
        return carry

    lax.fori_loop(0, s_tile, body, 0)

    # Drain the last k outstanding copies (static tail; slots are distinct).
    for i in range(k):
        r = s_tile - k + i
        _wait(r, r % k)


def positional_embedding(ids: jax.Array, weight: jax.Array, pad_index: int) -> jax.Array:
    """ids: (B, S) int token IDs; weight: (V, D) float. Returns (B, S, D)."""
    B, S = ids.shape
    V, D = weight.shape
    # positions reach pad_index + S; the table must cover them
    # (PyTorch nn.Embedding would raise on out-of-range indices).
    if V < pad_index + S + 1:
        raise ValueError(
            f"num_embeddings={V} too small for pad_index={pad_index}, seq_len={S} "
            f"(need >= {pad_index + S + 1})")

    ids = ids.astype(jnp.int32)
    mask = (ids != pad_index).astype(jnp.int32)
    # Tiny O(B*S) prolog (recommended by perf review); the heavy work -- the
    # embedding gather -- is done by the Pallas kernel via DMA.
    positions = jnp.cumsum(mask, axis=1) * mask + pad_index        # (B, S) int32

    # Pad the row axis up to a multiple of 8 so row tiles satisfy the (8,128)
    # block constraint for any S; pad rows gather weight[pad_index] and are
    # sliced off below.
    s_pad = ((S + 7) // 8) * 8
    if s_pad != S:
        positions = jnp.pad(positions, ((0, 0), (0, s_pad - S)),
                            constant_values=pad_index)

    s_tile = _pick_s_tile(s_pad, D)
    n_st = s_pad // s_tile

    kernel = functools.partial(_gather_rows_kernel, s_tile=s_tile)
    out2d = pl.pallas_call(
        kernel,
        out_shape=jax.ShapeDtypeStruct((B * s_pad, D), weight.dtype),
        grid_spec=pltpu.PrefetchScalarGridSpec(
            num_scalar_prefetch=1,                      # positions -> SMEM
            grid=(B, n_st),
            in_specs=[
                # Full (V, D) table stays in HBM; rows are DMA-gathered.
                pl.BlockSpec(memory_space=pl.ANY),
            ],
            # Lane-dense 2-D output: batch b, row-tile st writes rows
            # [ (b*n_st + st)*s_tile , ... + s_tile ).
            out_specs=pl.BlockSpec((s_tile, D),
                                   lambda b, st, pos: (b * n_st + st, 0)),
            scratch_shapes=[pltpu.SemaphoreType.DMA((_NSEM,))],
        ),
        compiler_params=pltpu.CompilerParams(
            dimension_semantics=("parallel", "parallel")),
    )(positions, weight)

    out = out2d.reshape(B, s_pad, D)
    if s_pad != S:
        out = out[:, :S, :]
    return out


def _reference(ids, weight, pad_index):
    mask = (ids != pad_index).astype(jnp.int32)
    positions = jnp.cumsum(mask, axis=1) * mask + pad_index
    return weight[positions]


if __name__ == "__main__":
    # Module config (small, synthetic).
    num_embeddings = 64   # V
    embedding_dim = 32    # D
    pad_index = 1
    B, S = 2, 8

    key = jax.random.PRNGKey(0)
    k_w, k_ids = jax.random.split(key)

    # Deterministic parameter init: nn.Embedding ~ N(0, 1), padding row zeroed.
    weight = jax.random.normal(k_w, (num_embeddings, embedding_dim), dtype=jnp.float32)
    weight = weight.at[pad_index].set(0.0)

    # Token IDs in [0, 16), some of which equal pad_index.
    ids = jax.random.randint(k_ids, (B, S), 0, 16, dtype=jnp.int32)

    out = positional_embedding(ids, weight, pad_index)
    out = jax.block_until_ready(out)

    ref = _reference(ids, weight, pad_index)
    assert out.shape == (B, S, embedding_dim)
    assert jnp.allclose(out, ref, atol=1e-6), "mismatch vs reference"

    print("KERNEL_OK")
</pallas_src>

<mosaic_0001>
module attributes {stable_mosaic.version = 11 : i64} {
  func.func @_gather_rows_kernel(%arg0: i32, %arg1: i32, %arg2: memref<2x8xi32, #tpu.memory_space<smem>>, %arg3: memref<64x32xf32, #tpu.memory_space<any>>, %arg4: memref<8x32xf32, #tpu.memory_space<vmem>>, %arg5: memref<16x!tpu.dma_semaphore, #tpu.memory_space<semaphore_mem>>) attributes {dimension_semantics = [#tpu.dimension_semantics<parallel>, #tpu.dimension_semantics<parallel>], iteration_bounds = array<i64: 2, 1>, scalar_prefetch = 1 : i64, scratch_operands = 1 : i64, tpu.core_type = #tpu.core_type<tc>, window_params = [{}, {transform_indices = @transform_1, window_bounds = array<i64: 8, 32>}]} {
    %c8_i32 = arith.constant 8 : i32
    %0 = arith.muli %arg1, %c8_i32 : i32
    %c0_i32 = arith.constant 0 : i32
    %c8_i32_0 = arith.constant 8 : i32
    %1 = arith.addi %c0_i32, %c8_i32_0 : i32
    %c1_i32 = arith.constant 1 : i32
    scf.for %arg6 = %c0_i32 to %1 step %c1_i32  : i32 {
      %c8_i32_36 = arith.constant 8 : i32
      %34 = arith.cmpi sge, %arg6, %c8_i32_36 : i32
      %35 = arith.extui %34 : i1 to i32
      %c0_i32_37 = arith.constant 0 : i32
      %36 = arith.cmpi ne, %35, %c0_i32_37 : i32
      scf.if %36 {
        %c8_i32_46 = arith.constant 8 : i32
        %55 = arith.subi %arg6, %c8_i32_46 : i32
        %c8_i32_47 = arith.constant 8 : i32
        %c0_i32_48 = arith.constant 0 : i32
        %56 = arith.cmpi eq, %c8_i32_47, %c0_i32_48 : i32
        %c1_i32_49 = arith.constant 1 : i32
        %57 = arith.select %56, %c1_i32_49, %c8_i32_47 : i32
        %58 = arith.remsi %arg6, %57 : i32
        %c0_i32_50 = arith.constant 0 : i32
        %59 = arith.cmpi ne, %58, %c0_i32_50 : i32
        %c0_i32_51 = arith.constant 0 : i32
        %60 = arith.cmpi slt, %58, %c0_i32_51 : i32
        %c0_i32_52 = arith.constant 0 : i32
        %61 = arith.cmpi slt, %57, %c0_i32_52 : i32
        %62 = arith.xori %60, %61 : i1
        %63 = arith.andi %62, %59 : i1
        %64 = arith.addi %58, %57 : i32
        %65 = arith.select %63, %64, %58 : i32
        %c0_i32_53 = arith.constant 0 : i32
        %c0_i32_54 = arith.constant 0 : i32
        %66 = tpu.memref_slice %arg3[%c0_i32_53, %c0_i32_54] : memref<64x32xf32, #tpu.memory_space<any>> -> memref<1x32xf32, #tpu.memory_space<any>>
        %c0_i32_55 = arith.constant 0 : i32
        %67 = tpu.memref_slice %arg4[%55, %c0_i32_55] : memref<8x32xf32, #tpu.memory_space<vmem>> -> memref<1x32xf32, #tpu.memory_space<vmem>>
        %68 = tpu.memref_slice %arg5[%65] : memref<16x!tpu.dma_semaphore, #tpu.memory_space<semaphore_mem>> -> memref<1x!tpu.dma_semaphore, #tpu.memory_space<semaphore_mem>>
        %69 = tpu.memref_squeeze %68 : memref<1x!tpu.dma_semaphore, #tpu.memory_space<semaphore_mem>> -> memref<!tpu.dma_semaphore, #tpu.memory_space<semaphore_mem>>
        tpu.wait_dma2 semaphore(%69 : memref<!tpu.dma_semaphore, #tpu.memory_space<semaphore_mem>>) src(%66 : memref<1x32xf32, #tpu.memory_space<any>>) dst(%67 : memref<1x32xf32, #tpu.memory_space<vmem>>)
      } else {
      }
      %c8_i32_38 = arith.constant 8 : i32
      %c0_i32_39 = arith.constant 0 : i32
      %37 = arith.cmpi eq, %c8_i32_38, %c0_i32_39 : i32
      %c1_i32_40 = arith.constant 1 : i32
      %38 = arith.select %37, %c1_i32_40, %c8_i32_38 : i32
      %39 = arith.remsi %arg6, %38 : i32
      %c0_i32_41 = arith.constant 0 : i32
      %40 = arith.cmpi ne, %39, %c0_i32_41 : i32
      %c0_i32_42 = arith.constant 0 : i32
      %41 = arith.cmpi slt, %39, %c0_i32_42 : i32
      %c0_i32_43 = arith.constant 0 : i32
      %42 = arith.cmpi slt, %38, %c0_i32_43 : i32
      %43 = arith.xori %41, %42 : i1
      %44 = arith.andi %43, %40 : i1
      %45 = arith.addi %39, %38 : i32
      %46 = arith.select %44, %45, %39 : i32
      %47 = arith.addi %0, %arg6 : i32
      %48 = arith.index_cast %arg0 : i32 to index
      %49 = arith.index_cast %47 : i32 to index
      %50 = memref.load %arg2[%48, %49] : memref<2x8xi32, #tpu.memory_space<smem>>
      %c0_i32_44 = arith.constant 0 : i32
      %51 = tpu.memref_slice %arg3[%50, %c0_i32_44] : memref<64x32xf32, #tpu.memory_space<any>> -> memref<1x32xf32, #tpu.memory_space<any>>
      %c0_i32_45 = arith.constant 0 : i32
      %52 = tpu.memref_slice %arg4[%arg6, %c0_i32_45] : memref<8x32xf32, #tpu.memory_space<vmem>> -> memref<1x32xf32, #tpu.memory_space<vmem>>
      %53 = tpu.memref_slice %arg5[%46] : memref<16x!tpu.dma_semaphore, #tpu.memory_space<semaphore_mem>> -> memref<1x!tpu.dma_semaphore, #tpu.memory_space<semaphore_mem>>
      %54 = tpu.memref_squeeze %53 : memref<1x!tpu.dma_semaphore, #tpu.memory_space<semaphore_mem>> -> memref<!tpu.dma_semaphore, #tpu.memory_space<semaphore_mem>>
      tpu.enqueue_dma source(%51 : memref<1x32xf32, #tpu.memory_space<any>>) target(%52 : memref<1x32xf32, #tpu.memory_space<vmem>>) target_semaphore(%54 : memref<!tpu.dma_semaphore, #tpu.memory_space<semaphore_mem>>)
    }
    %c8_i32_1 = arith.constant 8 : i32
    %c0_i32_2 = arith.constant 0 : i32
    %c0_i32_3 = arith.constant 0 : i32
    %c0_i32_4 = arith.constant 0 : i32
    %2 = tpu.memref_slice %arg3[%c0_i32_3, %c0_i32_4] : memref<64x32xf32, #tpu.memory_space<any>> -> memref<1x32xf32, #tpu.memory_space<any>>
    %c0_i32_5 = arith.constant 0 : i32
    %c0_i32_6 = arith.constant 0 : i32
    %3 = tpu.memref_slice %arg4[%c0_i32_5, %c0_i32_6] : memref<8x32xf32, #tpu.memory_space<vmem>> -> memref<1x32xf32, #tpu.memory_space<vmem>>
    %4 = tpu.memref_slice %arg5[%c0_i32_2] : memref<16x!tpu.dma_semaphore, #tpu.memory_space<semaphore_mem>> -> memref<1x!tpu.dma_semaphore, #tpu.memory_space<semaphore_mem>>
    %5 = tpu.memref_squeeze %4 : memref<1x!tpu.dma_semaphore, #tpu.memory_space<semaphore_mem>> -> memref<!tpu.dma_semaphore, #tpu.memory_space<semaphore_mem>>
    tpu.wait_dma2 semaphore(%5 : memref<!tpu.dma_semaphore, #tpu.memory_space<semaphore_mem>>) src(%2 : memref<1x32xf32, #tpu.memory_space<any>>) dst(%3 : memref<1x32xf32, #tpu.memory_space<vmem>>)
    %c1_i32_7 = arith.constant 1 : i32
    %c0_i32_8 = arith.constant 0 : i32
    %c0_i32_9 = arith.constant 0 : i32
    %6 = tpu.memref_slice %arg3[%c0_i32_8, %c0_i32_9] : memref<64x32xf32, #tpu.memory_space<any>> -> memref<1x32xf32, #tpu.memory_space<any>>
    %c1_i32_10 = arith.constant 1 : i32
    %c0_i32_11 = arith.constant 0 : i32
    %7 = tpu.memref_slice %arg4[%c1_i32_10, %c0_i32_11] : memref<8x32xf32, #tpu.memory_space<vmem>> -> memref<1x32xf32, #tpu.memory_space<vmem>>
    %8 = tpu.memref_slice %arg5[%c1_i32_7] : memref<16x!tpu.dma_semaphore, #tpu.memory_space<semaphore_mem>> -> memref<1x!tpu.dma_semaphore, #tpu.memory_space<semaphore_mem>>
    %9 = tpu.memref_squeeze %8 : memref<1x!tpu.dma_semaphore, #tpu.memory_space<semaphore_mem>> -> memref<!tpu.dma_semaphore, #tpu.memory_space<semaphore_mem>>
    tpu.wait_dma2 semaphore(%9 : memref<!tpu.dma_semaphore, #tpu.memory_space<semaphore_mem>>) src(%6 : memref<1x32xf32, #tpu.memory_space<any>>) dst(%7 : memref<1x32xf32, #tpu.memory_space<vmem>>)
    %c2_i32 = arith.constant 2 : i32
    %c0_i32_12 = arith.constant 0 : i32
    %c0_i32_13 = arith.constant 0 : i32
    %10 = tpu.memref_slice %arg3[%c0_i32_12, %c0_i32_13] : memref<64x32xf32, #tpu.memory_space<any>> -> memref<1x32xf32, #tpu.memory_space<any>>
    %c2_i32_14 = arith.constant 2 : i32
    %c0_i32_15 = arith.constant 0 : i32
    %11 = tpu.memref_slice %arg4[%c2_i32_14, %c0_i32_15] : memref<8x32xf32, #tpu.memory_space<vmem>> -> memref<1x32xf32, #tpu.memory_space<vmem>>
    %12 = tpu.memref_slice %arg5[%c2_i32] : memref<16x!tpu.dma_semaphore, #tpu.memory_space<semaphore_mem>> -> memref<1x!tpu.dma_semaphore, #tpu.memory_space<semaphore_mem>>
    %13 = tpu.memref_squeeze %12 : memref<1x!tpu.dma_semaphore, #tpu.memory_space<semaphore_mem>> -> memref<!tpu.dma_semaphore, #tpu.memory_space<semaphore_mem>>
    tpu.wait_dma2 semaphore(%13 : memref<!tpu.dma_semaphore, #tpu.memory_space<semaphore_mem>>) src(%10 : memref<1x32xf32, #tpu.memory_space<any>>) dst(%11 : memref<1x32xf32, #tpu.memory_space<vmem>>)
    %c3_i32 = arith.constant 3 : i32
    %c0_i32_16 = arith.constant 0 : i32
    %c0_i32_17 = arith.constant 0 : i32
    %14 = tpu.memref_slice %arg3[%c0_i32_16, %c0_i32_17] : memref<64x32xf32, #tpu.memory_space<any>> -> memref<1x32xf32, #tpu.memory_space<any>>
    %c3_i32_18 = arith.constant 3 : i32
    %c0_i32_19 = arith.constant 0 : i32
    %15 = tpu.memref_slice %arg4[%c3_i32_18, %c0_i32_19] : memref<8x32xf32, #tpu.memory_space<vmem>> -> memref<1x32xf32, #tpu.memory_space<vmem>>
    %16 = tpu.memref_slice %arg5[%c3_i32] : memref<16x!tpu.dma_semaphore, #tpu.memory_space<semaphore_mem>> -> memref<1x!tpu.dma_semaphore, #tpu.memory_space<semaphore_mem>>
    %17 = tpu.memref_squeeze %16 : memref<1x!tpu.dma_semaphore, #tpu.memory_space<semaphore_mem>> -> memref<!tpu.dma_semaphore, #tpu.memory_space<semaphore_mem>>
    tpu.wait_dma2 semaphore(%17 : memref<!tpu.dma_semaphore, #tpu.memory_space<semaphore_mem>>) src(%14 : memref<1x32xf32, #tpu.memory_space<any>>) dst(%15 : memref<1x32xf32, #tpu.memory_space<vmem>>)
    %c4_i32 = arith.constant 4 : i32
    %c0_i32_20 = arith.constant 0 : i32
    %c0_i32_21 = arith.constant 0 : i32
    %18 = tpu.memref_slice %arg3[%c0_i32_20, %c0_i32_21] : memref<64x32xf32, #tpu.memory_space<any>> -> memref<1x32xf32, #tpu.memory_space<any>>
    %c4_i32_22 = arith.constant 4 : i32
    %c0_i32_23 = arith.constant 0 : i32
    %19 = tpu.memref_slice %arg4[%c4_i32_22, %c0_i32_23] : memref<8x32xf32, #tpu.memory_space<vmem>> -> memref<1x32xf32, #tpu.memory_space<vmem>>
    %20 = tpu.memref_slice %arg5[%c4_i32] : memref<16x!tpu.dma_semaphore, #tpu.memory_space<semaphore_mem>> -> memref<1x!tpu.dma_semaphore, #tpu.memory_space<semaphore_mem>>
    %21 = tpu.memref_squeeze %20 : memref<1x!tpu.dma_semaphore, #tpu.memory_space<semaphore_mem>> -> memref<!tpu.dma_semaphore, #tpu.memory_space<semaphore_mem>>
    tpu.wait_dma2 semaphore(%21 : memref<!tpu.dma_semaphore, #tpu.memory_space<semaphore_mem>>) src(%18 : memref<1x32xf32, #tpu.memory_space<any>>) dst(%19 : memref<1x32xf32, #tpu.memory_space<vmem>>)
    %c5_i32 = arith.constant 5 : i32
    %c0_i32_24 = arith.constant 0 : i32
    %c0_i32_25 = arith.constant 0 : i32
    %22 = tpu.memref_slice %arg3[%c0_i32_24, %c0_i32_25] : memref<64x32xf32, #tpu.memory_space<any>> -> memref<1x32xf32, #tpu.memory_space<any>>
    %c5_i32_26 = arith.constant 5 : i32
    %c0_i32_27 = arith.constant 0 : i32
    %23 = tpu.memref_slice %arg4[%c5_i32_26, %c0_i32_27] : memref<8x32xf32, #tpu.memory_space<vmem>> -> memref<1x32xf32, #tpu.memory_space<vmem>>
    %24 = tpu.memref_slice %arg5[%c5_i32] : memref<16x!tpu.dma_semaphore, #tpu.memory_space<semaphore_mem>> -> memref<1x!tpu.dma_semaphore, #tpu.memory_space<semaphore_mem>>
    %25 = tpu.memref_squeeze %24 : memref<1x!tpu.dma_semaphore, #tpu.memory_space<semaphore_mem>> -> memref<!tpu.dma_semaphore, #tpu.memory_space<semaphore_mem>>
    tpu.wait_dma2 semaphore(%25 : memref<!tpu.dma_semaphore, #tpu.memory_space<semaphore_mem>>) src(%22 : memref<1x32xf32, #tpu.memory_space<any>>) dst(%23 : memref<1x32xf32, #tpu.memory_space<vmem>>)
    %c6_i32 = arith.constant 6 : i32
    %c0_i32_28 = arith.constant 0 : i32
    %c0_i32_29 = arith.constant 0 : i32
    %26 = tpu.memref_slice %arg3[%c0_i32_28, %c0_i32_29] : memref<64x32xf32, #tpu.memory_space<any>> -> memref<1x32xf32, #tpu.memory_space<any>>
    %c6_i32_30 = arith.constant 6 : i32
    %c0_i32_31 = arith.constant 0 : i32
    %27 = tpu.memref_slice %arg4[%c6_i32_30, %c0_i32_31] : memref<8x32xf32, #tpu.memory_space<vmem>> -> memref<1x32xf32, #tpu.memory_space<vmem>>
    %28 = tpu.memref_slice %arg5[%c6_i32] : memref<16x!tpu.dma_semaphore, #tpu.memory_space<semaphore_mem>> -> memref<1x!tpu.dma_semaphore, #tpu.memory_space<semaphore_mem>>
    %29 = tpu.memref_squeeze %28 : memref<1x!tpu.dma_semaphore, #tpu.memory_space<semaphore_mem>> -> memref<!tpu.dma_semaphore, #tpu.memory_space<semaphore_mem>>
    tpu.wait_dma2 semaphore(%29 : memref<!tpu.dma_semaphore, #tpu.memory_space<semaphore_mem>>) src(%26 : memref<1x32xf32, #tpu.memory_space<any>>) dst(%27 : memref<1x32xf32, #tpu.memory_space<vmem>>)
    %c7_i32 = arith.constant 7 : i32
    %c0_i32_32 = arith.constant 0 : i32
    %c0_i32_33 = arith.constant 0 : i32
    %30 = tpu.memref_slice %arg3[%c0_i32_32, %c0_i32_33] : memref<64x32xf32, #tpu.memory_space<any>> -> memref<1x32xf32, #tpu.memory_space<any>>
    %c7_i32_34 = arith.constant 7 : i32
    %c0_i32_35 = arith.constant 0 : i32
    %31 = tpu.memref_slice %arg4[%c7_i32_34, %c0_i32_35] : memref<8x32xf32, #tpu.memory_space<vmem>> -> memref<1x32xf32, #tpu.memory_space<vmem>>
    %32 = tpu.memref_slice %arg5[%c7_i32] : memref<16x!tpu.dma_semaphore, #tpu.memory_space<semaphore_mem>> -> memref<1x!tpu.dma_semaphore, #tpu.memory_space<semaphore_mem>>
    %33 = tpu.memref_squeeze %32 : memref<1x!tpu.dma_semaphore, #tpu.memory_space<semaphore_mem>> -> memref<!tpu.dma_semaphore, #tpu.memory_space<semaphore_mem>>
    tpu.wait_dma2 semaphore(%33 : memref<!tpu.dma_semaphore, #tpu.memory_space<semaphore_mem>>) src(%30 : memref<1x32xf32, #tpu.memory_space<any>>) dst(%31 : memref<1x32xf32, #tpu.memory_space<vmem>>)
    return
  }
  func.func @transform_1(%arg0: i32, %arg1: i32, %arg2: memref<2x8xi32, #tpu.memory_space<smem>>) -> (i32, i32) {
    %c1_i32 = arith.constant 1 : i32
    %0 = arith.muli %arg0, %c1_i32 : i32
    %1 = arith.addi %0, %arg1 : i32
    %c0_i32 = arith.constant 0 : i32
    %c0_i32_0 = arith.constant 0 : i32
    return %1, %c0_i32 : i32, i32
  }
}

</mosaic_0001>

<bundles_post_ra>
// kernel: tpu_custom_call.1
= control target key start
LH: loop header
LB: loop body
LE: loop exit
PB: predicated region body
PF: predicated region fallthrough
CT: control target
= control target key end

     0   :  { %s555_s12 = smov [#allocation4]   ;;  %s659_s0 = inlined_call_operand.vmem [shape: s32[2,8], index: 0, kind: input, shape index: {}]   ;;  %s660_s1 = inlined_call_operand.vmem [shape: f32[64,32], index: 1, kind: input, shape index: {}]   ;;  %s661_s2 = inlined_call_operand.hbm [shape: f32[16,32], index: 2, kind: output, shape index: {}]  }
   0x1   :  { %s8_s11 = sshll.u32 %s659_s0, 4  ;;  %s9_s11 = int_to_ptr.vmem [resolvable:$true] %s8_s11 }
   0x2   :  { %11 = dma.vmem_to_smem %s9_s11, 32, %s555_s12, [#allocation3] }
   0x3   :  { %509 = dma.done.wait [#allocation3], 32 }
   0x4   :  { %510 = vsyncadd [#allocation3], 4294967264 }
   0x5   :  { %14 = sfence }
   0x6   :  { %15 = vsyncpa [#allocation6], 0 }
   0x7   :  { %17 = vsyncpa [#allocation6 + $0x1], 0  ;;  %s574_s13 = smov 0   ;;  %s576_s14 = smov 0  }
   0x8   :  { %s578_s15 = smov 0   ;;  %s580_s16 = smov 0  }
   0x9 LB: > { %s32_s0 = sadd.s32 1, %s545_s15  ;;  %s366_s17 = sadd.s32 4294967295, %s549_s16   ;;  %s549_s16 = sphi %s580_s16, %s23_s16   ;;  %s545_s15 = sphi %s578_s15, %s666_s15   ;;  %s541_s14 = sphi %s576_s14, %s665_s14   ;;  %s537_s13 = sphi %s574_s13, %s664_s13  }
   0xa   : > { %p34_p0 = scmp.ge.s32.totalorder %s32_s0, 2  ;;  %p50_p1 = scmp.ne.s32.totalorder %s541_s14, %s537_s13 }
   0xb   : > { %s41_s18 = sadd.s32 1, %s541_s14  ;;  %p51_p2 = scmp.eq.s32.totalorder %s366_s17, 1 }
   0xc   : > { %s668_s0 = smov (%p34_p0, %s32_s0), 0  ;;  %p45_p3 = scmp.eq.s32.totalorder %s549_s16, 1 }
   0xd   : > { %s38_s19 = ssub.s32 %s545_s15, %s668_s0  ;;  %p604_p6 = por %p51_p2, %p50_p1 }
   0xe   : > { %p39_p4 = scmp.eq.s32.totalorder %s38_s19, 0  ;;  %p367_p5 = scmp.ne.s32.totalorder %s38_s19, 0 }
   0xf   : > { %p368_p8 = scmp.ge.s32.totalorder %s549_s16, 2 }
  0x10   : > { %s609_s21 = scalar_select %p39_p4, %s541_s14, %s41_s18  }
  0x11   : > { %p611_p7 = por %p367_p5, %p45_p3  ;;  %60 = sbr.rel (%p368_p8) target bundleno = 73 (0x49), region = 12 }
  0x12   : > { %s65_s23 = sand.u32 (!%p368_p8), 1, %s541_s14   ;;  %s622_s26 = smov (!%p368_p8), 0  }
  0x13   : > { %s619_s24 = sshll.u32 (!%p368_p8), %s65_s23, 3 }
  0x14   : > { %s67_s25 = scalar_lea.vmem (!%p368_p8), [#allocation5], %s619_s24 }
  0x16 LB: >> { %p406_p9 = scmp.ge.s32.totalorder %s553_s26, 8  ;;  %p80_p10 = scmp.lt.s32.totalorder %s553_s26, 0  ;;  %s553_s26 = sphi %s622_s26, %s75_s26  }
  0x17   : >> { %s81_s27 = ssub.s32 0, %s553_s26 }
  0x18   : >> { %s371_s28 = smin.u32 %s553_s26, %s81_s27 }
  0x19   : >> { %s83_s29 = sand.u32 7, %s371_s28  }
  0x1a   : >> { %s84_s30 = ssub.s32 0, %s83_s29 }
  0x1b   : >> { %s670_s30 = smov (!%p80_p10, %s84_s30), %s83_s29 }
  0x1c   : >> { %p373_p11 = scmp.lt.s32.totalorder %s670_s30, 0  ;;  %s90_s3 = sadd.s32 8, %s670_s30 }
  0x1e   : >> { %s672_s3 = smov (!%p373_p11, %s90_s3), %s670_s30 }
  0x1f   : >> { %s92_s4 = scalar_lea.sflag [#allocation2], %s672_s3 }
  0x20   : >> { %512 = dma.done.wait (%p406_p9), %s92_s4, 16 }
  0x21   : >> { %514 = vsyncadd (%p406_p9), %s92_s4, 4294967280  ;;  %s109_s5 = sshra.s32 %s553_s26, 7  ;;  %s114_s6 = sand.u32 127, %s553_s26 }
  0x22   : >> { %s111_s7 = sadd.s32 %s545_s15, %s109_s5  ;;  %s118_s11 = scalar_lea.vmem %s67_s25, %s553_s26 [#allocation5] }
  0x23   : >> { %s377_s8 = sshll.u32 %s111_s7, 7 }
  0x24   : >> { %s115_s9 = sadd.s32 %s377_s8, %s114_s6 }
  0x25   : >> { %s116_s10 = sld [smem:[#allocation4 + %s115_s9]] }
  0x2b   : >> { %s117_s18 = scalar_lea.vmem %s660_s1, %s116_s10 }
  0x2c   : >> { %v134_v0 = vld [vmem:[%s117_s18] sm:$0x1] }
  0x2d   : >> { %135 = vst [vmem:[%s118_s11] sm:$0x1] %v134_v0 }
  0x2e   : >> { %153 = vsyncadd %s92_s4, 16  ;;  %s75_s26 = sadd.s32 1, %s553_s26  }
  0x2f   : >> { %p72_p12 = scmp.ge.s32.totalorder %s75_s26, 8  }
  0x31   : > { %74 = sbr.rel (!%p72_p12) target bundleno = 22 (0x16), region = 115 }
  0x36   : > { %515 = dma.done.wait [#allocation2], 16 }
  0x37   : > { %516 = vsyncadd [#allocation2], 4294967280 }
  0x38   : > { %517 = dma.done.wait [#allocation2 + $0x1], 16 }
  0x39   : > { %518 = vsyncadd [#allocation2 + $0x1], 4294967280 }
  0x3a   : > { %519 = dma.done.wait [#allocation2 + $0x2], 16 }
  0x3b   : > { %520 = vsyncadd [#allocation2 + $0x2], 4294967280 }
  0x3c   : > { %521 = dma.done.wait [#allocation2 + $0x3], 16 }
  0x3d   : > { %522 = vsyncadd [#allocation2 + $0x3], 4294967280 }
  0x3e   : > { %523 = dma.done.wait [#allocation2 + $0x4], 16 }
  0x3f   : > { %524 = vsyncadd [#allocation2 + $0x4], 4294967280 }
  0x40   : > { %525 = dma.done.wait [#allocation2 + $0x5], 16 }
  0x41   : > { %526 = vsyncadd [#allocation2 + $0x5], 4294967280 }
  0x42   : > { %527 = dma.done.wait [#allocation2 + $0x6], 16 }
  0x43   : > { %528 = vsyncadd [#allocation2 + $0x6], 4294967280 }
  0x44   : > { %529 = dma.done.wait [#allocation2 + $0x7], 16 }
  0x45   : > { %530 = vsyncadd [#allocation2 + $0x7], 4294967280  ;;  %s379_s19 = sshll.u32 %s545_s15, 3  ;;  %s192_s29 = sshll.u32 %s67_s25, 4  ;;  %s193_s29 = int_to_ptr.vmem [resolvable:$true] %s192_s29 }
  0x46   : > { %s190_s28 = scalar_lea.hbm %s661_s2, %s379_s19  ;;  %s179_s3 = scalar_lea.sflag [#allocation6], %s65_s23 }
  0x47   : > { %s194_s30 = sshll.u32 %s190_s28, 4  ;;  %s195_s30 = int_to_ptr.hbm [resolvable:$true] %s194_s30 }
  0x48   : > { %400 = dma.vmem_to_hbm [thread:$0]  (%p611_p7), %s193_s29, 128, %s195_s30, %s179_s3  }
  0x49 PF: > { %p407_p13 = scmp.ge.s32.totalorder %s549_s16, 1  ;;  %s206_s4 = sand.u32 1, %s537_s13  }
  0x4a   : > { %s207_s15 = scalar_lea.sflag [#allocation6], %s206_s4 }
  0x4b   : > { %p403_p0 = pnand %p407_p13, %p604_p6 }
  0x4d   : > { %p404_p1 = pneg %p403_p0 }
  0x4f   : > { %532 = dma.done.wait (%p404_p1), %s207_s15, 128  }
  0x50   : > { %534 = vsyncadd (%p404_p1), %s207_s15, 4294967168  ;;  %s23_s16 = sadd.s32 1, %s549_s16   ;;  %s664_s13 = smov %s541_s14 }
  0x51   : > { %p20_p2 = scmp.ge.s32.totalorder %s23_s16, 3   ;;  %s665_s14 = smov %s609_s21 }
  0x52   : > { %s666_s15 = smov %s668_s0 }
  0x53   :  { %22 = sbr.rel (!%p20_p2) target bundleno = 9 (0x9), region = 126 }
  0x58   :  { %213 = vsyncpa [#allocation6], 1 }
  0x59   :  { %215 = vsyncpa [#allocation6 + $0x1], 1 }
  0x5a   :  { %216 = vsyncmov [#allocation2] }
  0x5d   :  { %s217_s20 = vpop.sfrf %216 }
  0x5e   :  { %p382_p3 = scmp.ne.s32.totalorder %s217_s20, 0 }
  0x60   :  { %221 = shalt.err (%p382_p3)  }
  0x61   :  { %223 = vsyncmov [#allocation2 + $0x1] }
  0x64   :  { %s224_s22 = vpop.sfrf %223 }
  0x65   :  { %p383_p4 = scmp.ne.s32.totalorder %s224_s22, 0 }
  0x67   :  { %228 = shalt.err (%p383_p4)  }
  0x68   :  { %230 = vsyncmov [#allocation2 + $0x2] }
  0x6b   :  { %s231_s23 = vpop.sfrf %230 }
  0x6c   :  { %p384_p5 = scmp.ne.s32.totalorder %s231_s23, 0 }
  0x6e   :  { %235 = shalt.err (%p384_p5)  }
  0x6f   :  { %237 = vsyncmov [#allocation2 + $0x3] }
  0x72   :  { %s238_s21 = vpop.sfrf %237 }
  0x73   :  { %p385_p6 = scmp.ne.s32.totalorder %s238_s21, 0 }
  0x75   :  { %242 = shalt.err (%p385_p6)  }
  0x76   :  { %244 = vsyncmov [#allocation2 + $0x4] }
  0x79   :  { %s245_s16 = vpop.sfrf %244 }
  0x7a   :  { %p386_p7 = scmp.ne.s32.totalorder %s245_s16, 0 }
  0x7c   :  { %249 = shalt.err (%p386_p7)  }
  0x7d   :  { %251 = vsyncmov [#allocation2 + $0x5] }
  0x80   :  { %s252_s1 = vpop.sfrf %251 }
  0x81   :  { %p387_p8 = scmp.ne.s32.totalorder %s252_s1, 0 }
  0x83   :  { %256 = shalt.err (%p387_p8)  }
  0x84   :  { %258 = vsyncmov [#allocation2 + $0x6] }
  0x87   :  { %s259_s2 = vpop.sfrf %258 }
  0x88   :  { %p388_p9 = scmp.ne.s32.totalorder %s259_s2, 0 }
  0x8a   :  { %263 = shalt.err (%p388_p9)  }
  0x8b   :  { %265 = vsyncmov [#allocation2 + $0x7] }
  0x8e   :  { %s266_s13 = vpop.sfrf %265 }
  0x8f   :  { %p389_p10 = scmp.ne.s32.totalorder %s266_s13, 0 }
  0x91   :  { %270 = shalt.err (%p389_p10)  }
  0x92   :  { %272 = vsyncmov [#allocation2 + $0x8] }
  0x95   :  { %s273_s14 = vpop.sfrf %272 }
  0x96   :  { %p390_p11 = scmp.ne.s32.totalorder %s273_s14, 0 }
  0x98   :  { %277 = shalt.err (%p390_p11)  }
  0x99   :  { %279 = vsyncmov [#allocation2 + $0x9] }
  0x9c   :  { %s280_s0 = vpop.sfrf %279 }
  0x9d   :  { %p391_p12 = scmp.ne.s32.totalorder %s280_s0, 0 }
  0x9f   :  { %284 = shalt.err (%p391_p12)  }
  0xa0   :  { %286 = vsyncmov [#allocation2 + $0xa] }
  0xa3   :  { %s287_s24 = vpop.sfrf %286 }
  0xa4   :  { %p392_p13 = scmp.ne.s32.totalorder %s287_s24, 0 }
  0xa6   :  { %291 = shalt.err (%p392_p13)  }
  0xa7   :  { %293 = vsyncmov [#allocation2 + $0xb] }
  0xaa   :  { %s294_s25 = vpop.sfrf %293 }
  0xab   :  { %p393_p0 = scmp.ne.s32.totalorder %s294_s25, 0 }
  0xad   :  { %298 = shalt.err (%p393_p0)  }
  0xae   :  { %300 = vsyncmov [#allocation2 + $0xc] }
  0xb1   :  { %s301_s5 = vpop.sfrf %300 }
  0xb2   :  { %p394_p1 = scmp.ne.s32.totalorder %s301_s5, 0 }
  0xb4   :  { %305 = shalt.err (%p394_p1)  }
  0xb5   :  { %307 = vsyncmov [#allocation2 + $0xd] }
  0xb8   :  { %s308_s6 = vpop.sfrf %307 }
  0xb9   :  { %p395_p2 = scmp.ne.s32.totalorder %s308_s6, 0 }
  0xbb   :  { %312 = shalt.err (%p395_p2)  }
  0xbc   :  { %314 = vsyncmov [#allocation2 + $0xe] }
  0xbf   :  { %s315_s7 = vpop.sfrf %314 }
  0xc0   :  { %p396_p3 = scmp.ne.s32.totalorder %s315_s7, 0 }
  0xc2   :  { %319 = shalt.err (%p396_p3)  }
  0xc3   :  { %321 = vsyncmov [#allocation2 + $0xf] }
  0xc6   :  { %s322_s8 = vpop.sfrf %321 }
  0xc7   :  { %p397_p4 = scmp.ne.s32.totalorder %s322_s8, 0 }
  0xc9   :  { %326 = shalt.err (%p397_p4)  }

</bundles_post_ra>
